<compile_context>
chip_gen: v5e
topology: v5e:2x2
jax: 0.10.0
libtpu: 0.0.40
codegen_flags: <defaults>
</compile_context>

<pallas_src>
import math

import jax
import jax.numpy as jnp
from jax.experimental import pallas as pl
from jax.experimental.pallas import tpu as pltpu

_LANE = 128
_SUBLANE = 8                          # f32 sublane packing; scaled per dtype
_TILE_BYTES = 4 * 1024 * 1024         # per x-tile budget (~16 MiB db in+out)
_VMEM_LIMIT_BYTES = 32 * 1024 * 1024  # explicit scoped VMEM, safe per-TC on v7x
_MAX_FLAT_LANE = 32768                # widest flattened lane row we build
_MIN_GRID_STEPS = 4                   # occupy both v7x TCs on large inputs
_MIN_SPLIT_BYTES = 1 << 20            # only force multi-step grids above this


def _affine_kernel(x_ref, w_ref, b_ref, o_ref):
    # Exactly one mul + one add (v5e: keep the compute side below the single
    # vst slot). w/b are (1, L) and broadcast over the sublane (row) axis.
    # Mixed dtypes (e.g. bf16 x, f32 params) promote implicitly to f32.
    o_ref[...] = x_ref[...] * w_ref[...] + b_ref[...]


def _choose_tile_rows(rows, lane, in_itemsize, out_itemsize):
    """Row-tile size: dtype-aware sublane rounding, VMEM budget, >=4 steps."""
    sub = max(_SUBLANE, (_SUBLANE * 4) // min(in_itemsize, out_itemsize))
    if rows <= sub:
        return rows                         # block == full extent -> legal
    row_bytes = lane * max(in_itemsize, out_itemsize)
    tb = min(rows, max(sub, _TILE_BYTES // row_bytes))
    if rows * row_bytes >= _MIN_SPLIT_BYTES:
        # v7x megacore: the "parallel" grid axis is sharded across 2 TCs;
        # make sure there are enough grid steps to occupy both and to keep
        # the DMA pipeline rolling.
        tb = min(tb, pl.cdiv(rows, _MIN_GRID_STEPS))
    tb = max(sub, (tb // sub) * sub)
    # TODO(synk): for absurdly large D (a single sub-row group of lanes no
    # longer fits the VMEM budget) the lane dim itself would need tiling.
    return tb


def _plan_layout(D):
    """Pick a lane-dense layout: ('D', D) | ('FLAT', lcm) | ('PAD_D', Dp)."""
    if D % _LANE == 0:
        return "D", D
    L = (D * _LANE) // math.gcd(D, _LANE)          # lcm(D, 128)
    if L <= _MAX_FLAT_LANE:
        return "FLAT", L
    # Very large non-128-multiple D: pad the last dim to a 128 multiple
    # (waste fraction < 128/D, small in this regime) -- still lane-dense.
    return "PAD_D", ((D + _LANE - 1) // _LANE) * _LANE


def _make_param_rows(weights, intercepts, mode, lane, compute_dtype):
    """Build the resident (1, lane) parameter rows for a given layout."""
    D = weights.shape[-1]
    w = weights.reshape(-1).astype(compute_dtype)
    b = intercepts.reshape(-1).astype(compute_dtype)
    if mode == "FLAT":
        reps = lane // D
        w = jnp.tile(w, reps)
        b = jnp.tile(b, reps)
    elif mode == "PAD_D":
        w = jnp.pad(w, (0, lane - D))
        b = jnp.pad(b, (0, lane - D))
    return w.reshape(1, lane), b.reshape(1, lane)


def _affine_call(x_flat, w_row, b_row, out_dtype, donate_x):
    rows, lane = x_flat.shape
    in_sz = jnp.dtype(x_flat.dtype).itemsize
    out_sz = jnp.dtype(out_dtype).itemsize
    tb = _choose_tile_rows(rows, lane, in_sz, out_sz)
    grid = (pl.cdiv(rows, tb),)

    extra = {}
    if donate_x and x_flat.dtype == jnp.dtype(out_dtype):
        extra["input_output_aliases"] = {0: 0}     # write output over x_flat

    return pl.pallas_call(
        _affine_kernel,
        out_shape=jax.ShapeDtypeStruct((rows, lane), out_dtype),
        grid=grid,
        in_specs=[
            pl.BlockSpec((tb, lane), lambda i: (i, 0)),
            pl.BlockSpec((1, lane), lambda i: (0, 0)),   # resident across grid
            pl.BlockSpec((1, lane), lambda i: (0, 0)),   # resident across grid
        ],
        out_specs=pl.BlockSpec((tb, lane), lambda i: (i, 0)),
        compiler_params=pltpu.CompilerParams(
            dimension_semantics=("parallel",),
            vmem_limit_bytes=_VMEM_LIMIT_BYTES,
        ),
        **extra,
    )(x_flat, w_row, b_row)


def independent_linear_with_intercept(x, weights, intercepts, *,
                                      param_rows=None, donate_x=False):
    """y = x * weights + intercepts, broadcast over all leading dims of x."""
    orig_shape = x.shape
    D = orig_shape[-1]
    total = x.size
    # Match PyTorch type promotion (e.g. bf16 x with f32 params -> f32 out).
    out_dtype = jnp.result_type(x.dtype, weights.dtype, intercepts.dtype)
    if total == 0:
        return jnp.zeros(orig_shape, out_dtype)

    mode, lane = _plan_layout(D)
    if param_rows is None:
        w_row, b_row = _make_param_rows(weights, intercepts, mode, lane,
                                        out_dtype)
    else:
        w_row, b_row = param_rows

    if mode == "D":
        x_flat = x.reshape(-1, lane)
    elif mode == "FLAT":
        flat = x.reshape(-1)
        pad = (-total) % lane
        if pad:
            # Each lane-row starts at a multiple of L (itself a multiple of
            # D), so the period-D weight tiling stays exact; the padded tail
            # is sliced off after the kernel.
            flat = jnp.pad(flat, (0, pad))
        x_flat = flat.reshape(-1, lane)
    else:  # PAD_D
        x_flat = jnp.pad(x.reshape(-1, D), ((0, 0), (0, lane - D)))

    out = _affine_call(x_flat, w_row, b_row, out_dtype, donate_x)

    if mode == "D":
        return out.reshape(orig_shape)
    if mode == "FLAT":
        return out.reshape(-1)[:total].reshape(orig_shape)
    return out[:, :D].reshape(orig_shape)


class IndependentLinearLayerWithIntercept:
    """JAX/Pallas port of the PyTorch module (weights=ones, intercepts=zeros).

    Caches the tiled & cast (1, L) parameter rows so repeated calls do not
    rebuild them (removes fixed per-call overhead for this microsecond-scale,
    HBM-bound op)."""

    def __init__(self, input_dim, dtype=jnp.float32):
        self.input_dim = input_dim
        self.weights = jnp.ones((input_dim,), dtype)
        self.intercepts = jnp.zeros((input_dim,), dtype)
        self._row_cache = {}

    def _rows(self, mode, lane, out_dtype):
        key = (mode, lane, jnp.dtype(out_dtype).name)
        if key not in self._row_cache:
            self._row_cache[key] = _make_param_rows(
                self.weights, self.intercepts, mode, lane, out_dtype)
        return self._row_cache[key]

    def __call__(self, x, donate_x=False):
        out_dtype = jnp.result_type(x.dtype, self.weights.dtype,
                                    self.intercepts.dtype)
        mode, lane = _plan_layout(x.shape[-1])
        return independent_linear_with_intercept(
            x, self.weights, self.intercepts,
            param_rows=self._rows(mode, lane, out_dtype),
            donate_x=donate_x)


if __name__ == "__main__":
    key = jax.random.PRNGKey(0)
    batch, input_dim = 8, 32

    layer = IndependentLinearLayerWithIntercept(input_dim)
    # Give params non-trivial values so the checks are meaningful.
    k1, k2, k3 = jax.random.split(key, 3)
    layer.weights = jax.random.normal(k1, (input_dim,), jnp.float32)
    layer.intercepts = jax.random.normal(k2, (input_dim,), jnp.float32)
    layer._row_cache.clear()

    # 2-D batch.
    x = jax.random.normal(k3, (batch, input_dim), jnp.float32)
    out = jax.block_until_ready(layer(x))
    ref = x * layer.weights + layer.intercepts
    assert out.shape == ref.shape and out.dtype == ref.dtype
    assert jnp.allclose(out, ref, atol=1e-6), "mismatch vs reference (2D)"

    # Multi-dim batch (broadcast over all leading dims).
    x3 = jax.random.normal(jax.random.PRNGKey(1), (2, 4, input_dim),
                           jnp.float32)
    out3 = jax.block_until_ready(layer(x3))
    ref3 = x3 * layer.weights + layer.intercepts
    assert jnp.allclose(out3, ref3, atol=1e-6), "mismatch vs reference (3D)"

    # Ragged case: D not a multiple of 128 and total not a multiple of
    # lcm(D, 128) -> exercises the padded lane-dense path.
    D_r = 12
    layer_r = IndependentLinearLayerWithIntercept(D_r)
    xr = jax.random.normal(jax.random.PRNGKey(2), (5, D_r), jnp.float32)
    outr = jax.block_until_ready(layer_r(xr))
    refr = xr * layer_r.weights + layer_r.intercepts
    assert jnp.allclose(outr, refr, atol=1e-6), "mismatch vs reference (ragged)"

    # bf16 input with f32 params promotes to f32 (matches PyTorch semantics).
    xb = jax.random.normal(jax.random.PRNGKey(3), (batch, input_dim),
                           jnp.bfloat16)
    outb = jax.block_until_ready(layer(xb))
    refb = xb.astype(jnp.float32) * layer.weights + layer.intercepts
    assert outb.dtype == jnp.float32
    assert jnp.allclose(outb, refb, atol=1e-5), "mismatch vs reference (bf16)"

    print("KERNEL_OK")
</pallas_src>

<mosaic_0001>
module attributes {stable_mosaic.version = 11 : i64} {
  func.func @_affine_kernel(%arg0: i32, %arg1: memref<2x128xf32, #tpu.memory_space<vmem>>, %arg2: memref<1x128xf32, #tpu.memory_space<vmem>>, %arg3: memref<1x128xf32, #tpu.memory_space<vmem>>, %arg4: memref<2x128xf32, #tpu.memory_space<vmem>>) attributes {dimension_semantics = [#tpu.dimension_semantics<parallel>], iteration_bounds = array<i64: 1>, scalar_prefetch = 0 : i64, scratch_operands = 0 : i64, tpu.core_type = #tpu.core_type<tc>, window_params = [{transform_indices = @transform_0, window_bounds = array<i64: 2, 128>}, {pipeline_mode = #tpu.pipeline_mode<synchronous>, transform_indices = @transform_1, window_bounds = array<i64: 1, 128>}, {pipeline_mode = #tpu.pipeline_mode<synchronous>, transform_indices = @transform_2, window_bounds = array<i64: 1, 128>}, {transform_indices = @transform_3, window_bounds = array<i64: 2, 128>}]} {
    %c0 = arith.constant 0 : index
    %c0_0 = arith.constant 0 : index
    %0 = vector.load %arg1[%c0, %c0_0] : memref<2x128xf32, #tpu.memory_space<vmem>>, vector<2x128xf32>
    %c0_1 = arith.constant 0 : index
    %c0_2 = arith.constant 0 : index
    %1 = vector.load %arg2[%c0_1, %c0_2] : memref<1x128xf32, #tpu.memory_space<vmem>>, vector<1x128xf32>
    %2 = vector.broadcast %1 : vector<1x128xf32> to vector<2x128xf32>
    %3 = arith.mulf %0, %2 : vector<2x128xf32>
    %c0_3 = arith.constant 0 : index
    %c0_4 = arith.constant 0 : index
    %4 = vector.load %arg3[%c0_3, %c0_4] : memref<1x128xf32, #tpu.memory_space<vmem>>, vector<1x128xf32>
    %5 = vector.broadcast %4 : vector<1x128xf32> to vector<2x128xf32>
    %6 = arith.addf %3, %5 : vector<2x128xf32>
    %c0_5 = arith.constant 0 : index
    %c0_6 = arith.constant 0 : index
    %7 = vector.load %arg4[%c0_5, %c0_6] : memref<2x128xf32, #tpu.memory_space<vmem>>, vector<2x128xf32>
    tpu.vector_store %arg4[%c0_5, %c0_6], %6 {strides = array<i32>} : memref<2x128xf32, #tpu.memory_space<vmem>>, vector<2x128xf32>,
    return
  }
  func.func @transform_0(%arg0: i32) -> (i32, i32) {
    %c0_i32 = arith.constant 0 : i32
    %c0_i32_0 = arith.constant 0 : i32
    return %arg0, %c0_i32 : i32, i32
  }
  func.func @transform_1(%arg0: i32) -> (i32, i32) {
    %c0_i32 = arith.constant 0 : i32
    %c0_i32_0 = arith.constant 0 : i32
    %c0_i32_1 = arith.constant 0 : i32
    return %c0_i32, %c0_i32_0 : i32, i32
  }
  func.func @transform_2(%arg0: i32) -> (i32, i32) {
    %c0_i32 = arith.constant 0 : i32
    %c0_i32_0 = arith.constant 0 : i32
    %c0_i32_1 = arith.constant 0 : i32
    return %c0_i32, %c0_i32_0 : i32, i32
  }
  func.func @transform_3(%arg0: i32) -> (i32, i32) {
    %c0_i32 = arith.constant 0 : i32
    %c0_i32_0 = arith.constant 0 : i32
    return %arg0, %c0_i32 : i32, i32
  }
}

</mosaic_0001>

<bundles_post_ra>
// kernel: tpu_custom_call.1
= control target key start
LH: loop header
LB: loop body
LE: loop exit
PB: predicated region body
PF: predicated region fallthrough
CT: control target
= control target key end

     0   :  { %8 = vsyncpa [#allocation3], 0  ;;  %s191_s0 = inlined_call_operand.hbm [shape: f32[2,128], index: 0, kind: input, shape index: {}]   ;;  %s192_s1 = inlined_call_operand.hbm [shape: f32[1,128], index: 1, kind: input, shape index: {}]   ;;  %s193_s2 = inlined_call_operand.vmem [shape: f32[1,128], index: 2, kind: input, shape index: {}]   ;;  %s194_s3 = inlined_call_operand.hbm [shape: f32[2,128], index: 3, kind: output, shape index: {}]  }
   0x1   :  { %9 = vsyncpa [#allocation6], 0 }
   0x2   :  { %10 = vsyncpa [#allocation4], 0  ;;  %s16_s14 = sshll.u32 %s191_s0, 4  ;;  %s156_s15 = smov [#allocation2]   ;;  %s17_s14 = int_to_ptr.hbm [resolvable:$true] %s16_s14 }
   0x3   :  { %s18_s16 = sshll.u32 %s156_s15, 4  ;;  %s27_s19 = sshll.u32 %s192_s1, 4  ;;  %s19_s16 = int_to_ptr.vmem [resolvable:$true] %s18_s16  ;;  %s28_s19 = int_to_ptr.hbm [resolvable:$true] %s27_s19 }
   0x4   :  { %21 = dma.hbm_to_vmem [thread:$0]  %s17_s14, 32, %s19_s16, [#allocation3]  }
   0x5   :  { %s157_s20 = smov [#allocation5]  }
   0x6   :  { %s29_s21 = sshll.u32 %s157_s20, 4  ;;  %s30_s21 = int_to_ptr.vmem [resolvable:$true] %s29_s21 }
   0x7   :  { %32 = dma.hbm_to_vmem [thread:$0]  %s28_s19, 16, %s30_s21, [#allocation6]  }
   0x8   :  { %150 = dma.done.wait [#allocation3], 32  }
   0x9   :  { %151 = vsyncadd [#allocation3], 4294967264 }
   0xa   :  { %152 = dma.done.wait [#allocation6], 16  }
   0xb   :  { %153 = vsyncadd [#allocation6], 4294967280  ;;  %v43_v0 = vld [vmem:[#allocation2] sm:$0x3]  ;;  %v76_v1 = vld [vmem:[#allocation5] ss:$0 sm:$0xff] }
   0xc   :  { %v77_v2 = vld [vmem:[%s193_s2] ss:$0 sm:$0xff]  ;;  %s158_s23 = smov [#allocation7]   ;;  %s62_s26 = sshll.u32 %s194_s3, 4  ;;  %v48_v3 = vmul.f32 %v76_v1, %v43_v0  ;;  %s63_s26 = int_to_ptr.hbm [resolvable:$true] %s62_s26 }
   0xd   :  { %s60_s24 = sshll.u32 %s158_s23, 4  ;;  %s61_s24 = int_to_ptr.vmem [resolvable:$true] %s60_s24 }
   0xe   :  { %v53_v4 = vadd.f32 %v77_v2, %v48_v3 }
  0x10   :  { %54 = vst [vmem:[#allocation7] sm:$0x3] %v53_v4 }
  0x11   :  { %65 = dma.vmem_to_hbm [thread:$0]  %s61_s24, 32, %s63_s26, [#allocation4]  }
  0x12   :  { %154 = dma.done.wait [#allocation4], 32  }
  0x13   :  { %155 = vsyncadd [#allocation4], 4294967264 }
  0x14   :  { %70 = vsyncpa [#allocation3], 1 }
  0x15   :  { %71 = vsyncpa [#allocation6], 1 }
  0x16   :  { %72 = vsyncpa [#allocation4], 1 }

</bundles_post_ra>
